<compile_context>
chip_gen: v6e
topology: v6e:2x2x1
jax: 0.10.0
libtpu: 0.0.40
codegen_flags: <defaults>
</compile_context>

<pallas_src>
import math

import jax
import jax.numpy as jnp
from jax.experimental import pallas as pl
from jax.experimental.pallas import tpu as pltpu

D_IN = 1024  # fixed by the module: nn.Linear(1024, 1)


def _default_row_tile():
    """Rows of the flattened (B*L) axis per grid step, per TPU generation."""
    try:
        kind = jax.devices()[0].device_kind.lower()
    except Exception:
        kind = ""
    if "v6" in kind or "v7" in kind:
        # 8 MiB X block -> 16 MiB double buffered; amortizes the ~0.35 us
        # per-step overhead at 1.4-3.2 TB/s HBM, fits the 32 MiB default
        # scoped-VMEM on v6e and v7x (v7x has 64 MiB physical per TC).
        return 2048
    # v5e (and fallback): 4 MiB block / 8 MiB double buffered fits the
    # 16 MiB default scoped-VMEM limit comfortably.
    return 1024


def _logreg_kernel(x_ref, w_ref, b_ref, o_ref):
    # x_ref: (TM, D)  VMEM block of flattened input rows
    # w_ref: (D, 1)   VMEM weight column (grid-resident: constant index_map)
    # b_ref: (1, 1)   SMEM scalar bias
    # o_ref: (TM, 1)  VMEM output block
    #
    # Natural (M,K)@(K,1) orientation: no operand relayout of the large X
    # tile; the tiny (TM, 1) result store is masked but negligible.
    y = jnp.dot(x_ref[...], w_ref[...], preferred_element_type=jnp.float32)
    o_ref[...] = (y + b_ref[0, 0]).astype(o_ref.dtype)


def network_forward(x, padding_mask, weight, bias, *, row_tile=None):
    """Pallas equivalent of Network.forward(X, padding_mask).

    x:            (B, L, 1024) float32
    padding_mask: unused (kept for signature parity with the PyTorch module)
    weight:       (1, 1024) float32  (PyTorch Linear weight layout)
    bias:         (1,) float32
    returns:      (B, L) float32
    """
    del padding_mask  # unused in the reference forward
    B, L, D = x.shape
    assert D == D_IN

    n_rows = B * L
    if row_tile is None:
        row_tile = _default_row_tile()

    # Shrink the tile for small inputs so the grid has >= 2 steps: enables
    # DMA/compute overlap everywhere and lets both v7x TensorCores get work.
    half_rows = -(-n_rows // 2)            # ceil(n_rows / 2)
    half_rows = -(-half_rows // 8) * 8     # round up to a sublane multiple
    row_tile = max(8, min(row_tile, half_rows))

    grid_n = pl.cdiv(n_rows, row_tile)     # non-divisible grid: no pad copy;
                                           # Pallas masks the partial last block.

    x2 = x.reshape(n_rows, D)              # view, no copy
    w_col = weight.reshape(D, 1)           # (1024, 1) column, natural MXU layout
    bias2d = bias.reshape(1, 1).astype(jnp.float32)

    itemsize = x2.dtype.itemsize
    # Cover the X double buffer plus generous margin for weight/output/internal.
    vmem_limit = max(2 * row_tile * D * itemsize + (4 << 20), 16 << 20)

    out = pl.pallas_call(
        _logreg_kernel,
        out_shape=jax.ShapeDtypeStruct((n_rows, 1), x.dtype),
        grid_spec=pltpu.PrefetchScalarGridSpec(
            num_scalar_prefetch=0,
            grid=(grid_n,),
            in_specs=[
                # X row tile: (row_tile, 1024) f32.
                pl.BlockSpec((row_tile, D), lambda i: (i, 0)),
                # Weight column: full (1024, 1), constant block index -> resident.
                pl.BlockSpec((D, 1), lambda i: (0, 0)),
                # Bias scalar lives in SMEM (no padded VMEM vreg tile).
                pl.BlockSpec(memory_space=pltpu.MemorySpace.SMEM),
            ],
            # (row_tile, 1) output block; last dim equals the full array dim.
            out_specs=pl.BlockSpec((row_tile, 1), lambda i: (i, 0)),
        ),
        compiler_params=pltpu.CompilerParams(
            dimension_semantics=("parallel",),   # v7x: shard row tiles over TCs
            vmem_limit_bytes=int(vmem_limit)),
        cost_estimate=pl.CostEstimate(
            flops=2 * n_rows * D,
            bytes_accessed=n_rows * D * itemsize + n_rows * itemsize + D * itemsize,
            transcendentals=0),
    )(x2, w_col, bias2d)

    return out.reshape(B, L)


if __name__ == "__main__":
    key = jax.random.PRNGKey(0)
    k_x, k_w, k_b = jax.random.split(key, 3)

    B, L = 2, 8  # small batch / seq; feature dim fixed at 1024 by the module
    x = jax.random.normal(k_x, (B, L, D_IN), dtype=jnp.float32)
    padding_mask = jnp.ones((B, L), dtype=jnp.bool_)  # unused, parity only

    # Deterministic parameter init (Linear(1024, 1): weight (1,1024), bias (1,))
    bound = 1.0 / math.sqrt(D_IN)
    weight = jax.random.uniform(k_w, (1, D_IN), jnp.float32, -bound, bound)
    bias = jax.random.uniform(k_b, (1,), jnp.float32, -bound, bound)

    out = network_forward(x, padding_mask, weight, bias)
    out = jax.block_until_ready(out)

    # Reference check in plain JAX (same math as torch nn.Linear + squeeze(2))
    ref = (x @ weight.T + bias)[..., 0]
    assert out.shape == (B, L)
    assert jnp.allclose(out, ref, atol=1e-5, rtol=1e-5)

    print("KERNEL_OK")
</pallas_src>

<mosaic_0001>
module attributes {stable_mosaic.version = 11 : i64} {
  func.func @_logreg_kernel(%arg0: i32, %arg1: memref<8x1024xf32, #tpu.memory_space<vmem>>, %arg2: memref<1024x1xf32, #tpu.memory_space<vmem>>, %arg3: memref<1x1xf32, #tpu.memory_space<smem>>, %arg4: memref<8x1xf32, #tpu.memory_space<vmem>>) attributes {dimension_semantics = [#tpu.dimension_semantics<parallel>], iteration_bounds = array<i64: 2>, scalar_prefetch = 0 : i64, scratch_operands = 0 : i64, tpu.core_type = #tpu.core_type<tc>, window_params = [{transform_indices = @transform_0, window_bounds = array<i64: 8, 1024>}, {pipeline_mode = #tpu.pipeline_mode<synchronous>, transform_indices = @transform_1, window_bounds = array<i64: 1024, 1>}, {transform_indices = @transform_2, window_bounds = array<i64: 1, 1>}, {transform_indices = @transform_3, window_bounds = array<i64: 8, 1>}]} {
    %c0 = arith.constant 0 : index
    %c0_0 = arith.constant 0 : index
    %0 = vector.load %arg1[%c0, %c0_0] : memref<8x1024xf32, #tpu.memory_space<vmem>>, vector<8x1024xf32>
    %c0_1 = arith.constant 0 : index
    %c0_2 = arith.constant 0 : index
    %1 = vector.load %arg2[%c0_1, %c0_2] : memref<1024x1xf32, #tpu.memory_space<vmem>>, vector<1024x1xf32>
    %cst = arith.constant dense<0.000000e+00> : vector<8x1xf32>
    %2 = tpu.matmul %0, %1, %cst {dimension_numbers = #tpu.dot_dimension_numbers<[1], [0], [0], [1], [0, 0, 1, 1], [], []>} : vector<8x1024xf32>, vector<1024x1xf32>, vector<8x1xf32> -> vector<8x1xf32>
    %c0_3 = arith.constant 0 : index
    %c0_4 = arith.constant 0 : index
    %3 = memref.load %arg3[%c0_3, %c0_4] : memref<1x1xf32, #tpu.memory_space<smem>>
    %4 = vector.broadcast %3 : f32 to vector<8x1xf32>
    %5 = arith.addf %2, %4 : vector<8x1xf32>
    %c0_5 = arith.constant 0 : index
    %c0_6 = arith.constant 0 : index
    %6 = vector.load %arg4[%c0_5, %c0_6] : memref<8x1xf32, #tpu.memory_space<vmem>>, vector<8x1xf32>
    tpu.vector_store %arg4[%c0_5, %c0_6], %5 {strides = array<i32>} : memref<8x1xf32, #tpu.memory_space<vmem>>, vector<8x1xf32>,
    return
  }
  func.func @transform_0(%arg0: i32) -> (i32, i32) {
    %c0_i32 = arith.constant 0 : i32
    %c0_i32_0 = arith.constant 0 : i32
    return %arg0, %c0_i32 : i32, i32
  }
  func.func @transform_1(%arg0: i32) -> (i32, i32) {
    %c0_i32 = arith.constant 0 : i32
    %c0_i32_0 = arith.constant 0 : i32
    %c0_i32_1 = arith.constant 0 : i32
    return %c0_i32, %c0_i32_0 : i32, i32
  }
  func.func @transform_2(%arg0: i32) -> (i32, i32) {
    %c0_i32 = arith.constant 0 : i32
    %c0_i32_0 = arith.constant 0 : i32
    %c0_i32_1 = arith.constant 0 : i32
    return %c0_i32, %c0_i32_0 : i32, i32
  }
  func.func @transform_3(%arg0: i32) -> (i32, i32) {
    %c0_i32 = arith.constant 0 : i32
    %c0_i32_0 = arith.constant 0 : i32
    return %arg0, %c0_i32 : i32, i32
  }
}

</mosaic_0001>

<bundles_post_ra>
// kernel: tpu_custom_call.1
= control target key start
LH: loop header
LB: loop body
LE: loop exit
PB: predicated region body
PF: predicated region fallthrough
CT: control target
= control target key end

     0   :  { %s833_s14 = smov 0   ;;  %s1258_s0 = inlined_call_operand.vmem [shape: f32[16,1024], index: 0, kind: input, shape index: {}]   ;;  %s1259_s1 = inlined_call_operand.vmem [shape: f32[1024,1], index: 1, kind: input, shape index: {}]   ;;  %s1260_s2 = inlined_call_operand.<no memory space> [shape: f32[1,1], index: 2, kind: input, shape index: {}]   ;;  %s1261_s3 = inlined_call_operand.vmem [shape: f32[16,1], index: 3, kind: output, shape index: {}]  }
   0x1   :  { %8 = sst [smem:[#allocation2]] %s1260_s2 }
   0x2 LB: > { %s643_s15 = sadd.s32 4294967295, %s808_s14   ;;  %p647_p0 = scmp.ge.s32.totalorder %s808_s14, 1  ;;  %s808_s14 = sphi %s833_s14, %s14_s14  }
   0x3   : > { %p138_p1 = scmp.lt.s32.totalorder %s808_s14, 3 }
   0x5   : > { %p139_p2 = pnand %p647_p0, %p138_p1 }
   0x6   : > { %p951_p3 = scmp.lt.s32.totalorder (!%p139_p2), %s643_s15, 1  ;;  %s306_s21 = sld [smem:[#allocation2]] (!%p139_p2) }
   0x7   : > { %142 = sbr.rel (%p139_p2) target bundleno = 283 (0x11b), region = 32 }
   0xc   : > { %v209_v0 = vld [vmem:[%s1259_s1 + $0xf8] sm:$0xff]  ;;  %v208_v4 = vld [vmem:[%s1259_s1 + $0xf0] sm:$0xff]  ;;  %v207_v8 = vld [vmem:[%s1259_s1 + $0xe8] sm:$0xff]  ;;  %s1264_s15 = smov (!%p951_p3, %s643_s15), 1  ;;  %vm588_vm0 = vcmask 7168  }
   0xd   : > { %v241_v1 = vld [vmem:[%s1259_s1 + $0x1f8] sm:$0xff]  ;;  %654 = vmatprep.subr.mxu0 %v209_v0  ;;  %v240_v5 = vld [vmem:[%s1259_s1 + $0x1f0] sm:$0xff]  ;;  %v239_v9 = vld [vmem:[%s1259_s1 + $0x1e8] sm:$0xff]  ;;  %s653_s17 = sshll.u32 %s1264_s15, 6 }
   0xe   : > { %v193_v2 = vld [vmem:[%s1259_s1 + $0x78] sm:$0xff]  ;;  %689 = vmatprep.subr.mxu1 %v241_v1  ;;  %v192_v6 = vld [vmem:[%s1259_s1 + $0x70] sm:$0xff]  ;;  %v191_v10 = vld [vmem:[%s1259_s1 + $0x68] sm:$0xff]  ;;  %s1031_s4 = scalar_lea.vmem %s1258_s0, %s653_s17 }
   0xf   : > { %v225_v3 = vld [vmem:[%s1259_s1 + $0x178] sm:$0xff]  ;;  %655 = vmatpush3.msra.mxu0 %v193_v2  ;;  %v224_v7 = vld [vmem:[%s1259_s1 + $0x170] sm:$0xff]  ;;  %v223_v11 = vld [vmem:[%s1259_s1 + $0x168] sm:$0xff] }
  0x10   : > { %690 = vmatpush3.msra.mxu1 %v225_v3  ;;  %656 = vmatprep.subr.mxu0 %v208_v4  ;;  %v206_v12 = vld [vmem:[%s1259_s1 + $0xe0] sm:$0xff]  ;;  %v205_v16 = vld [vmem:[%s1259_s1 + $0xd8] sm:$0xff]  ;;  %v204_v20 = vld [vmem:[%s1259_s1 + $0xd0] sm:$0xff] }
  0x11   : > { %691 = vmatprep.subr.mxu1 %v240_v5  ;;  %657 = vmatpush3.msra.mxu0 %v192_v6  ;;  %v238_v13 = vld [vmem:[%s1259_s1 + $0x1e0] sm:$0xff]  ;;  %v237_v17 = vld [vmem:[%s1259_s1 + $0x1d8] sm:$0xff]  ;;  %v236_v21 = vld [vmem:[%s1259_s1 + $0x1d0] sm:$0xff] }
  0x12   : > { %692 = vmatpush3.msra.mxu1 %v224_v7  ;;  %658 = vmatprep.subr.mxu0 %v207_v8  ;;  %v190_v14 = vld [vmem:[%s1259_s1 + $0x60] sm:$0xff]  ;;  %v189_v18 = vld [vmem:[%s1259_s1 + $0x58] sm:$0xff]  ;;  %v188_v22 = vld [vmem:[%s1259_s1 + $0x50] sm:$0xff] }
  0x13   : > { %693 = vmatprep.subr.mxu1 %v239_v9  ;;  %v222_v15 = vld [vmem:[%s1259_s1 + $0x160] sm:$0xff]  ;;  %659 = vmatpush3.msra.mxu0 %v191_v10  ;;  %v221_v19 = vld [vmem:[%s1259_s1 + $0x158] sm:$0xff]  ;;  %v220_v23 = vld [vmem:[%s1259_s1 + $0x150] sm:$0xff] }
  0x14   : > { %694 = vmatpush3.msra.mxu1 %v223_v11  ;;  %660 = vmatprep.subr.mxu0 %v206_v12  ;;  %v203_v24 = vld [vmem:[%s1259_s1 + $0xc8] sm:$0xff]  ;;  %v202_v28 = vld [vmem:[%s1259_s1 + $0xc0] sm:$0xff]  ;;  %v201_v32 = vld [vmem:[%s1259_s1 + $0xb8] sm:$0xff] }
  0x15   : > { %695 = vmatprep.subr.mxu1 %v238_v13  ;;  %661 = vmatpush3.msra.mxu0 %v190_v14  ;;  %v235_v25 = vld [vmem:[%s1259_s1 + $0x1c8] sm:$0xff]  ;;  %v234_v29 = vld [vmem:[%s1259_s1 + $0x1c0] sm:$0xff]  ;;  %v233_v33 = vld [vmem:[%s1259_s1 + $0x1b8] sm:$0xff] }
  0x16   : > { %696 = vmatpush3.msra.mxu1 %v222_v15  ;;  %662 = vmatprep.subr.mxu0 %v205_v16  ;;  %v187_v26 = vld [vmem:[%s1259_s1 + $0x48] sm:$0xff]  ;;  %v186_v30 = vld [vmem:[%s1259_s1 + $0x40] sm:$0xff]  ;;  %v185_v34 = vld [vmem:[%s1259_s1 + $0x38] sm:$0xff] }
  0x17   : > { %697 = vmatprep.subr.mxu1 %v237_v17  ;;  %663 = vmatpush3.msra.mxu0 %v189_v18  ;;  %v219_v27 = vld [vmem:[%s1259_s1 + $0x148] sm:$0xff]  ;;  %v218_v31 = vld [vmem:[%s1259_s1 + $0x140] sm:$0xff]  ;;  %v217_v35 = vld [vmem:[%s1259_s1 + $0x138] sm:$0xff] }
  0x18   : > { %698 = vmatpush3.msra.mxu1 %v221_v19  ;;  %664 = vmatprep.subr.mxu0 %v204_v20  ;;  %v200_v36 = vld [vmem:[%s1259_s1 + $0xb0] sm:$0xff]  ;;  %v199_v40 = vld [vmem:[%s1259_s1 + $0xa8] sm:$0xff]  ;;  %v198_v44 = vld [vmem:[%s1259_s1 + $0xa0] sm:$0xff] }
  0x19   : > { %699 = vmatprep.subr.mxu1 %v236_v21  ;;  %665 = vmatpush3.msra.mxu0 %v188_v22  ;;  %v232_v37 = vld [vmem:[%s1259_s1 + $0x1b0] sm:$0xff]  ;;  %v231_v41 = vld [vmem:[%s1259_s1 + $0x1a8] sm:$0xff]  ;;  %v230_v45 = vld [vmem:[%s1259_s1 + $0x1a0] sm:$0xff] }
  0x1a   : > { %700 = vmatpush3.msra.mxu1 %v220_v23  ;;  %666 = vmatprep.subr.mxu0 %v203_v24  ;;  %v184_v38 = vld [vmem:[%s1259_s1 + $0x30] sm:$0xff]  ;;  %v183_v42 = vld [vmem:[%s1259_s1 + $0x28] sm:$0xff]  ;;  %v182_v46 = vld [vmem:[%s1259_s1 + $0x20] sm:$0xff] }
  0x1b   : > { %701 = vmatprep.subr.mxu1 %v235_v25  ;;  %667 = vmatpush3.msra.mxu0 %v187_v26  ;;  %v216_v39 = vld [vmem:[%s1259_s1 + $0x130] sm:$0xff]  ;;  %v215_v43 = vld [vmem:[%s1259_s1 + $0x128] sm:$0xff]  ;;  %v214_v47 = vld [vmem:[%s1259_s1 + $0x120] sm:$0xff] }
  0x1c   : > { %702 = vmatpush3.msra.mxu1 %v219_v27  ;;  %668 = vmatprep.subr.mxu0 %v202_v28  ;;  %v197_v48 = vld [vmem:[%s1259_s1 + $0x98] sm:$0xff]  ;;  %v196_v52 = vld [vmem:[%s1259_s1 + $0x90] sm:$0xff]  ;;  %v195_v56 = vld [vmem:[%s1259_s1 + $0x88] sm:$0xff] }
  0x1d   : > { %703 = vmatprep.subr.mxu1 %v234_v29  ;;  %669 = vmatpush3.msra.mxu0 %v186_v30  ;;  %v229_v49 = vld [vmem:[%s1259_s1 + $0x198] sm:$0xff]  ;;  %v228_v53 = vld [vmem:[%s1259_s1 + $0x190] sm:$0xff]  ;;  %v227_v57 = vld [vmem:[%s1259_s1 + $0x188] sm:$0xff] }
  0x1e   : > { %704 = vmatpush3.msra.mxu1 %v218_v31  ;;  %670 = vmatprep.subr.mxu0 %v201_v32  ;;  %v181_v50 = vld [vmem:[%s1259_s1 + $0x18] sm:$0xff]  ;;  %v180_v54 = vld [vmem:[%s1259_s1 + $0x10] sm:$0xff]  ;;  %v179_v58 = vld [vmem:[%s1259_s1 + $0x8] sm:$0xff] }
  0x1f   : > { %705 = vmatprep.subr.mxu1 %v233_v33  ;;  %671 = vmatpush3.msra.mxu0 %v185_v34  ;;  %v213_v51 = vld [vmem:[%s1259_s1 + $0x118] sm:$0xff]  ;;  %v212_v55 = vld [vmem:[%s1259_s1 + $0x110] sm:$0xff]  ;;  %v211_v59 = vld [vmem:[%s1259_s1 + $0x108] sm:$0xff] }
  0x20   : > { %706 = vmatpush3.msra.mxu1 %v217_v35  ;;  %672 = vmatprep.subr.mxu0 %v200_v36  ;;  %v194_v60 = vld [vmem:[%s1259_s1 + $0x80] sm:$0xff]  ;;  %v171_v63 = vld [vmem:[%s1031_s4 + $0x8] sm:$0xff]  ;;  %v173_v2 = vld [vmem:[%s1031_s4 + $0x18] sm:$0xff] }
  0x21   : > { %707 = vmatprep.subr.mxu1 %v232_v37  ;;  %673 = vmatpush3.msra.mxu0 %v184_v38  ;;  %v226_v61 = vld [vmem:[%s1259_s1 + $0x180] sm:$0xff]  ;;  %v273_v3 = vld [vmem:[%s1259_s1 + $0x2f8] sm:$0xff]  ;;  %v172_v5 = vld [vmem:[%s1031_s4 + $0x10] sm:$0xff] }
  0x22   : > { %708 = vmatpush3.msra.mxu1 %v216_v39  ;;  %674 = vmatprep.subr.mxu0 %v199_v40  ;;  %v178_v62 = vld [vmem:[%s1259_s1] sm:$0xff]  ;;  %v305_v4 = vld [vmem:[%s1259_s1 + $0x3f8] sm:$0xff]  ;;  %v272_v8 = vld [vmem:[%s1259_s1 + $0x2f0] sm:$0xff] }
  0x23   : > { %709 = vmatprep.subr.mxu1 %v231_v41  ;;  %675 = vmatpush3.msra.mxu0 %v183_v42  ;;  %v210_v0 = vld [vmem:[%s1259_s1 + $0x100] sm:$0xff]  ;;  %v257_v6 = vld [vmem:[%s1259_s1 + $0x278] sm:$0xff]  ;;  %v304_v9 = vld [vmem:[%s1259_s1 + $0x3f0] sm:$0xff] }
  0x24   : > { %710 = vmatpush3.msra.mxu1 %v215_v43  ;;  %676 = vmatprep.subr.mxu0 %v198_v44  ;;  %v170_v1 = vld [vmem:[%s1031_s4] sm:$0xff]  ;;  %v289_v7 = vld [vmem:[%s1259_s1 + $0x378] sm:$0xff]  ;;  %v256_v10 = vld [vmem:[%s1259_s1 + $0x270] sm:$0xff] }
  0x25   : > { %711 = vmatprep.subr.mxu1 %v230_v45  ;;  %677 = vmatpush3.msra.mxu0 %v182_v46  ;;  %v288_v11 = vld [vmem:[%s1259_s1 + $0x370] sm:$0xff]  ;;  %v271_v12 = vld [vmem:[%s1259_s1 + $0x2e8] sm:$0xff]  ;;  %v270_v16 = vld [vmem:[%s1259_s1 + $0x2e0] sm:$0xff] }
  0x26   : > { %712 = vmatpush3.msra.mxu1 %v214_v47  ;;  %678 = vmatprep.subr.mxu0 %v197_v48  ;;  %v303_v13 = vld [vmem:[%s1259_s1 + $0x3e8] sm:$0xff]  ;;  %v302_v17 = vld [vmem:[%s1259_s1 + $0x3e0] sm:$0xff]  ;;  %v269_v20 = vld [vmem:[%s1259_s1 + $0x2d8] sm:$0xff] }
  0x27   : > { %713 = vmatprep.subr.mxu1 %v229_v49  ;;  %679 = vmatpush3.msra.mxu0 %v181_v50  ;;  %v255_v14 = vld [vmem:[%s1259_s1 + $0x268] sm:$0xff]  ;;  %v254_v18 = vld [vmem:[%s1259_s1 + $0x260] sm:$0xff]  ;;  %v301_v21 = vld [vmem:[%s1259_s1 + $0x3d8] sm:$0xff] }
  0x28   : > { %714 = vmatpush3.msra.mxu1 %v213_v51  ;;  %680 = vmatprep.subr.mxu0 %v196_v52  ;;  %v287_v15 = vld [vmem:[%s1259_s1 + $0x368] sm:$0xff]  ;;  %v286_v19 = vld [vmem:[%s1259_s1 + $0x360] sm:$0xff]  ;;  %v253_v22 = vld [vmem:[%s1259_s1 + $0x258] sm:$0xff] }
  0x29   : > { %715 = vmatprep.subr.mxu1 %v228_v53  ;;  %681 = vmatpush3.msra.mxu0 %v180_v54  ;;  %v285_v23 = vld [vmem:[%s1259_s1 + $0x358] sm:$0xff]  ;;  %v268_v24 = vld [vmem:[%s1259_s1 + $0x2d0] sm:$0xff]  ;;  %v267_v28 = vld [vmem:[%s1259_s1 + $0x2c8] sm:$0xff] }
  0x2a   : > { %716 = vmatpush3.msra.mxu1 %v212_v55  ;;  %682 = vmatprep.subr.mxu0 %v195_v56  ;;  %v300_v25 = vld [vmem:[%s1259_s1 + $0x3d0] sm:$0xff]  ;;  %v299_v29 = vld [vmem:[%s1259_s1 + $0x3c8] sm:$0xff]  ;;  %v266_v32 = vld [vmem:[%s1259_s1 + $0x2c0] sm:$0xff] }
  0x2b   : > { %717 = vmatprep.subr.mxu1 %v227_v57  ;;  %683 = vmatpush3.msra.mxu0 %v179_v58  ;;  %v252_v26 = vld [vmem:[%s1259_s1 + $0x250] sm:$0xff]  ;;  %v251_v30 = vld [vmem:[%s1259_s1 + $0x248] sm:$0xff]  ;;  %v298_v33 = vld [vmem:[%s1259_s1 + $0x3c0] sm:$0xff] }
  0x2c   : > { %718 = vmatpush3.msra.mxu1 %v211_v59  ;;  %684 = vmatprep.subr.mxu0 %v194_v60  ;;  %v284_v27 = vld [vmem:[%s1259_s1 + $0x350] sm:$0xff]  ;;  %v283_v31 = vld [vmem:[%s1259_s1 + $0x348] sm:$0xff]  ;;  %v250_v34 = vld [vmem:[%s1259_s1 + $0x240] sm:$0xff] }
  0x2d   : > { %719 = vmatprep.subr.mxu1 %v226_v61  ;;  %685 = vmatpush3.msra.mxu0 %v178_v62  ;;  %v282_v35 = vld [vmem:[%s1259_s1 + $0x340] sm:$0xff]  ;;  %v265_v36 = vld [vmem:[%s1259_s1 + $0x2b8] sm:$0xff]  ;;  %v264_v40 = vld [vmem:[%s1259_s1 + $0x2b0] sm:$0xff] }
  0x2e   : > { %372 = vmatprep.mubr.f32.mxu0 %v171_v63  ;;  %720 = vmatpush3.msra.mxu1 %v210_v0  ;;  %v297_v37 = vld [vmem:[%s1259_s1 + $0x3b8] sm:$0xff]  ;;  %v296_v41 = vld [vmem:[%s1259_s1 + $0x3b0] sm:$0xff]  ;;  %v263_v44 = vld [vmem:[%s1259_s1 + $0x2a8] sm:$0xff] }
  0x2f   : > { %373 = vmatmul.mubr.f32.vlgmr.msra.gmra.mxu0 %v170_v1  ;;  %442 = vmatprep.mubr.f32.mxu1 %v173_v2  ;;  %v249_v38 = vld [vmem:[%s1259_s1 + $0x238] sm:$0xff]  ;;  %v248_v42 = vld [vmem:[%s1259_s1 + $0x230] sm:$0xff]  ;;  %v295_v45 = vld [vmem:[%s1259_s1 + $0x3a8] sm:$0xff] }
  0x30   : > { %724 = vmatprep.subr.mxu0 %v273_v3  ;;  %759 = vmatprep.subr.mxu1 %v305_v4  ;;  %v281_v39 = vld [vmem:[%s1259_s1 + $0x338] sm:$0xff]  ;;  %v280_v43 = vld [vmem:[%s1259_s1 + $0x330] sm:$0xff]  ;;  %v247_v46 = vld [vmem:[%s1259_s1 + $0x228] sm:$0xff] }
  0x31   : > { %443 = vmatmul.mubr.f32.vlgmr.msra.gmra.mxu1 %v172_v5  ;;  %725 = vmatpush3.msra.mxu0 %v257_v6  ;;  %v279_v47 = vld [vmem:[%s1259_s1 + $0x328] sm:$0xff]  ;;  %v262_v48 = vld [vmem:[%s1259_s1 + $0x2a0] sm:$0xff]  ;;  %v261_v52 = vld [vmem:[%s1259_s1 + $0x298] sm:$0xff] }
  0x32   : > { %760 = vmatpush3.msra.mxu1 %v289_v7  ;;  %726 = vmatprep.subr.mxu0 %v272_v8  ;;  %v294_v49 = vld [vmem:[%s1259_s1 + $0x3a0] sm:$0xff]  ;;  %v293_v53 = vld [vmem:[%s1259_s1 + $0x398] sm:$0xff]  ;;  %v260_v56 = vld [vmem:[%s1259_s1 + $0x290] sm:$0xff] }
  0x33   : > { %761 = vmatprep.subr.mxu1 %v304_v9  ;;  %727 = vmatpush3.msra.mxu0 %v256_v10  ;;  %v246_v50 = vld [vmem:[%s1259_s1 + $0x220] sm:$0xff]  ;;  %v245_v54 = vld [vmem:[%s1259_s1 + $0x218] sm:$0xff]  ;;  %v292_v57 = vld [vmem:[%s1259_s1 + $0x390] sm:$0xff] }
  0x34   : > { %762 = vmatpush3.msra.mxu1 %v288_v11  ;;  %728 = vmatprep.subr.mxu0 %v271_v12  ;;  %v278_v51 = vld [vmem:[%s1259_s1 + $0x320] sm:$0xff]  ;;  %v277_v55 = vld [vmem:[%s1259_s1 + $0x318] sm:$0xff]  ;;  %v244_v58 = vld [vmem:[%s1259_s1 + $0x210] sm:$0xff]  ;;  %v307_v12 = vstv %s306_s21 }
  0x35   : > { %763 = vmatprep.subr.mxu1 %v303_v13  ;;  %729 = vmatpush3.msra.mxu0 %v255_v14  ;;  %v276_v59 = vld [vmem:[%s1259_s1 + $0x310] sm:$0xff]  ;;  %v259_v60 = vld [vmem:[%s1259_s1 + $0x288] sm:$0xff]  ;;  %v258_v0 = vld [vmem:[%s1259_s1 + $0x280] sm:$0xff] }
  0x36   : > { %764 = vmatpush3.msra.mxu1 %v287_v15  ;;  %730 = vmatprep.subr.mxu0 %v270_v16  ;;  %v291_v61 = vld [vmem:[%s1259_s1 + $0x388] sm:$0xff]  ;;  %v290_v1 = vld [vmem:[%s1259_s1 + $0x380] sm:$0xff]  ;;  %v177_v5 = vld [vmem:[%s1031_s4 + $0x38] sm:$0xff] }
  0x37   : > { %765 = vmatprep.subr.mxu1 %v302_v17  ;;  %731 = vmatpush3.msra.mxu0 %v254_v18  ;;  %v243_v62 = vld [vmem:[%s1259_s1 + $0x208] sm:$0xff]  ;;  %v242_v2 = vld [vmem:[%s1259_s1 + $0x200] sm:$0xff]  ;;  %v176_v7 = vld [vmem:[%s1031_s4 + $0x30] sm:$0xff] }
  0x38   : > { %766 = vmatpush3.msra.mxu1 %v286_v19  ;;  %732 = vmatprep.subr.mxu0 %v269_v20  ;;  %v275_v63 = vld [vmem:[%s1259_s1 + $0x308] sm:$0xff]  ;;  %v274_v4 = vld [vmem:[%s1259_s1 + $0x300] sm:$0xff] }
  0x39   : > { %767 = vmatprep.subr.mxu1 %v301_v21  ;;  %733 = vmatpush3.msra.mxu0 %v253_v22  ;;  %v175_v3 = vld [vmem:[%s1031_s4 + $0x28] sm:$0xff]  ;;  %v174_v6 = vld [vmem:[%s1031_s4 + $0x20] sm:$0xff]  ;;  %s650_s4 = sshll.u32 %s1264_s15, 3 }
  0x3a   : > { %768 = vmatpush3.msra.mxu1 %v285_v23  ;;  %734 = vmatprep.subr.mxu0 %v268_v24  ;;  %s169_s24 = scalar_lea.vmem %s1261_s3, %s650_s4 }
  0x3b   : > { %769 = vmatprep.subr.mxu1 %v300_v25  ;;  %735 = vmatpush3.msra.mxu0 %v252_v26 }
  0x3c   : > { %770 = vmatpush3.msra.mxu1 %v284_v27  ;;  %736 = vmatprep.subr.mxu0 %v267_v28 }
  0x3d   : > { %771 = vmatprep.subr.mxu1 %v299_v29  ;;  %737 = vmatpush3.msra.mxu0 %v251_v30 }
  0x3e   : > { %772 = vmatpush3.msra.mxu1 %v283_v31  ;;  %738 = vmatprep.subr.mxu0 %v266_v32 }
  0x3f   : > { %773 = vmatprep.subr.mxu1 %v298_v33  ;;  %739 = vmatpush3.msra.mxu0 %v250_v34 }
  0x40   : > { %774 = vmatpush3.msra.mxu1 %v282_v35  ;;  %740 = vmatprep.subr.mxu0 %v265_v36 }
  0x41   : > { %775 = vmatprep.subr.mxu1 %v297_v37  ;;  %741 = vmatpush3.msra.mxu0 %v249_v38 }
  0x42   : > { %776 = vmatpush3.msra.mxu1 %v281_v39  ;;  %742 = vmatprep.subr.mxu0 %v264_v40 }
  0x43   : > { %777 = vmatprep.subr.mxu1 %v296_v41  ;;  %743 = vmatpush3.msra.mxu0 %v248_v42 }
  0x44   : > { %778 = vmatpush3.msra.mxu1 %v280_v43  ;;  %744 = vmatprep.subr.mxu0 %v263_v44 }
  0x45   : > { %779 = vmatprep.subr.mxu1 %v295_v45  ;;  %745 = vmatpush3.msra.mxu0 %v247_v46 }
  0x46   : > { %780 = vmatpush3.msra.mxu1 %v279_v47  ;;  %746 = vmatprep.subr.mxu0 %v262_v48 }
  0x47   : > { %781 = vmatprep.subr.mxu1 %v294_v49  ;;  %747 = vmatpush3.msra.mxu0 %v246_v50 }
  0x48   : > { %782 = vmatpush3.msra.mxu1 %v278_v51  ;;  %748 = vmatprep.subr.mxu0 %v261_v52 }
  0x49   : > { %783 = vmatprep.subr.mxu1 %v293_v53  ;;  %749 = vmatpush3.msra.mxu0 %v245_v54 }
  0x4a   : > { %784 = vmatpush3.msra.mxu1 %v277_v55  ;;  %750 = vmatprep.subr.mxu0 %v260_v56 }
  0x4b   : > { %785 = vmatprep.subr.mxu1 %v292_v57  ;;  %751 = vmatpush3.msra.mxu0 %v244_v58 }
  0x4c   : > { %786 = vmatpush3.msra.mxu1 %v276_v59  ;;  %752 = vmatprep.subr.mxu0 %v259_v60 }
  0x4d   : > { %787 = vmatprep.subr.mxu1 %v291_v61  ;;  %753 = vmatpush3.msra.mxu0 %v243_v62 }
  0x4e   : > { %788 = vmatpush3.msra.mxu1 %v275_v63  ;;  %754 = vmatprep.subr.mxu0 %v258_v0 }
  0x4f   : > { %789 = vmatprep.subr.mxu1 %v290_v1  ;;  %755 = vmatpush3.msra.mxu0 %v242_v2 }
  0x50   : > { %512 = vmatprep.mubr.f32.mxu0 %v175_v3  ;;  %790 = vmatpush3.msra.mxu1 %v274_v4 }
  0x51   : > { %582 = vmatprep.mubr.f32.mxu1 %v177_v5  ;;  %513 = vmatmul.mubr.f32.vlgmr.msra.gmra.mxu0 %v174_v6 }
  0x52   : > { %583 = vmatmul.mubr.f32.vlgmr.msra.gmra.mxu1 %v176_v7 }
  0xef   : > { %v686_v8 = vpop.f32.mrf.mxu0 }
  0xf1   : > { %v721_v9 = vpop.f32.mrf.mxu1  ;;  %v687_v10 = vpop.f32.mrf.mxu0 }
  0xf2   : > { %v688_v11 = vadd.f32 %v687_v10, %v686_v8 }
  0xf3   : > { %v722_v13 = vpop.f32.mrf.mxu1 }
  0xf4   : > { %v375_v14 = vadd.f32 %v688_v11, %v307_v12  ;;  %v723_v15 = vadd.f32 %v722_v13, %v721_v9 }
  0xf6   : > { %v445_v20 = vadd.f32 %v723_v15, %v375_v14 }
 0x111   : > { %v756_v16 = vpop.f32.mrf.mxu0 }
 0x112   : > { %v791_v17 = vpop.f32.mrf.mxu1 }
 0x113   : > { %v757_v18 = vpop.f32.mrf.mxu0 }
 0x114   : > { %v792_v19 = vpop.f32.mrf.mxu1  ;;  %v758_v21 = vadd.f32 %v757_v18, %v756_v16 }
 0x115   : > { %v793_v23 = vadd.f32 %v792_v19, %v791_v17 }
 0x116   : > { %v515_v22 = vadd.f32 %v758_v21, %v445_v20 }
 0x118   : > { %v585_v24 = vadd.f32 %v793_v23, %v515_v22 }
 0x11a   : > { %589 = vst.msk [vmem:[%s169_s24] sm:$0xff] %vm588_vm0, %v585_v24 }
 0x11b PF: > { %s14_s14 = sadd.s32 1, %s808_s14  }
 0x11c   : > { %p11_p4 = scmp.ge.s32.totalorder %s14_s14, 4  }
 0x11e   :  { %13 = sbr.rel (!%p11_p4) target bundleno = 2 (0x2), region = 62 }

</bundles_post_ra>
